<compile_context>
chip_gen: v7x
topology: tpu7x:2x2x1
jax: 0.10.0
libtpu: 0.0.40
codegen_flags: <defaults>
</compile_context>

<pallas_src>
import functools

import jax
import jax.numpy as jnp
from jax.experimental import pallas as pl
from jax.experimental.pallas import tpu as pltpu


def _round_up(x, m):
    return ((x + m - 1) // m) * m


def _round_down(x, m):
    return (x // m) * m


# ----------------------------- kernels ------------------------------------ #

def _linear1_kernel(x_ref, w_ref, b_ref, o_ref):
    # Single affine layer (covers n_hl==0, and n_hl==1 after affine fusion).
    o_ref[...] = (
        jnp.dot(x_ref[...], w_ref[...], preferred_element_type=jnp.float32)
        + b_ref[...]
    )


def _linear2_relu_kernel(x_ref, w0_ref, b0_ref, w1_ref, b1_ref, o_ref):
    # n_hl==2 after fusing the first two (ReLU-free) affine layers:
    #   h = x @ W01 + b01 ; h = relu(h) ; out = h @ W2 + b2
    h = (
        jnp.dot(x_ref[...], w0_ref[...], preferred_element_type=jnp.float32)
        + b0_ref[...]
    )
    h = jnp.maximum(h, 0.0)
    o_ref[...] = (
        jnp.dot(h, w1_ref[...], preferred_element_type=jnp.float32) + b1_ref[...]
    )


_KERNELS = {1: _linear1_kernel, 2: _linear2_relu_kernel}


# ------------------------- parameter preparation --------------------------- #

def prepare_params(params, n_hl):
    """One-time prep: fuse ReLU-free affine layers and make the hidden dim lane-dense.

    params: flat tuple (W0, b0, W1, b1, ...) with W: [in, out], b: [1, out].
    Returns (prepped_params, num_layers, action_size).
    NOTE: must be re-run after every weight update (padded entries must stay zero).
    """
    ws = [jnp.asarray(w, jnp.float32) for w in params[0::2]]
    bs = [jnp.asarray(b, jnp.float32) for b in params[1::2]]

    if n_hl >= 1:
        # Reference applies NO ReLU between `input` and `hl1` -> exact affine fusion.
        w01 = ws[0] @ ws[1]
        b01 = bs[0] @ ws[1] + bs[1]
        ws = [w01] + ws[2:]
        bs = [b01] + bs[2:]

    if len(ws) == 2:
        # n_hl == 2: pad the fused hidden dim to a multiple of 128 so the
        # intermediate activation is lane-dense. Exact because ReLU(0) = 0 and
        # the matching zero rows appended to W2 contribute nothing.
        hidden = int(ws[0].shape[-1])
        hidden_pad = _round_up(max(hidden, 128), 128)
        pad = hidden_pad - hidden
        if pad:
            ws[0] = jnp.pad(ws[0], ((0, 0), (0, pad)))
            bs[0] = jnp.pad(bs[0], ((0, 0), (0, pad)))
            ws[1] = jnp.pad(ws[1], ((0, pad), (0, 0)))

    action_size = int(ws[-1].shape[-1])
    flat = []
    for w, b in zip(ws, bs):
        flat.extend([w, b])
    return tuple(flat), len(ws), action_size


# ------------------------------- forward ----------------------------------- #

_PALLAS_MIN_BATCH = 256          # below this, fused XLA dots beat custom-call dispatch
_TWO_STEP_MIN_BATCH = 1024       # split into 2 tiles -> both v7x TensorCores busy
_BLOCK_VMEM_BUDGET = 16 * 1024 * 1024   # budget for pipelined blocks
_VMEM_LIMIT_BYTES = 32 * 1024 * 1024    # <= physical VMEM on every generation


def _forward_jax(x, prepped, num_layers):
    out = x @ prepped[0] + prepped[1]
    if num_layers == 2:
        out = jnp.maximum(out, 0.0)
        out = out @ prepped[2] + prepped[3]
    return out


@functools.partial(jax.jit, static_argnames=("num_layers", "use_pallas"))
def net_forward(x, prepped, *, num_layers, use_pallas=None):
    """Forward pass using prepared (fused + hidden-padded) params."""
    x = jnp.asarray(x, jnp.float32)
    batch, in_features = x.shape
    out_dim = int(prepped[-1].shape[-1])

    if use_pallas is None:
        use_pallas = batch >= _PALLAS_MIN_BATCH
    if not use_pallas:
        # Tiny-batch inference path: the whole forward is a few KFLOPs; a fused
        # XLA dot_general wins purely on dispatch/launch overhead.
        return _forward_jax(x, prepped, num_layers)

    hidden_pad = int(prepped[0].shape[-1]) if num_layers == 2 else 0

    # VMEM per batch row: double-buffered x and out blocks plus the f32
    # intermediate activation (2-layer case only). Weights are tiny and constant.
    per_row_bytes = 4 * (2 * in_features + 2 * out_dim + hidden_pad)
    tm_max = max(8, _round_down(_BLOCK_VMEM_BUDGET // max(per_row_bytes, 1), 8))

    # Few grid steps: 1 step for moderate batches, 2 steps for large batches so a
    # v7x megacore can split the batch across its two TensorCores.
    target_steps = 2 if batch >= _TWO_STEP_MIN_BATCH else 1
    tm = min(_round_up(pl.cdiv(batch, target_steps), 8), tm_max)
    grid = (pl.cdiv(batch, tm),)   # ragged last tile handled by Pallas (masked write)

    x_spec = pl.BlockSpec((tm, in_features), lambda i: (i, 0))
    param_specs = [pl.BlockSpec(p.shape, lambda i: (0, 0)) for p in prepped]
    out_spec = pl.BlockSpec((tm, out_dim), lambda i: (i, 0))

    # Advisory cost estimate so XLA schedules the custom call sensibly.
    ws = prepped[0::2]
    flops = 2 * batch * sum(int(w.shape[0]) * int(w.shape[1]) for w in ws)
    bytes_accessed = 4 * (
        batch * in_features + sum(int(p.size) for p in prepped) + batch * out_dim
    )
    ce = pl.CostEstimate(flops=flops, transcendentals=0, bytes_accessed=bytes_accessed)

    out = pl.pallas_call(
        _KERNELS[num_layers],
        out_shape=jax.ShapeDtypeStruct((batch, out_dim), jnp.float32),
        grid=grid,
        in_specs=[x_spec] + param_specs,
        out_specs=out_spec,
        compiler_params=pltpu.CompilerParams(
            dimension_semantics=("parallel",),      # batch tiles are independent
            vmem_limit_bytes=_VMEM_LIMIT_BYTES,
        ),
        cost_estimate=ce,
    )(x, *prepped)
    return out


# --------------------------- init & reference ------------------------------- #

def init_net_params(key, input_size, hidden_size, action_size):
    """Deterministic synthetic init of the Linear layers (W: [in,out], b: [1,out])."""
    n_hl = len(hidden_size)
    dims = [input_size] + list(hidden_size) + [action_size]
    params = []
    for i in range(len(dims) - 1):
        key, kw, kb = jax.random.split(key, 3)
        bound = 1.0 / float(jnp.sqrt(dims[i]))
        w = jax.random.uniform(
            kw, (dims[i], dims[i + 1]), jnp.float32, minval=-bound, maxval=bound
        )
        b = jax.random.uniform(
            kb, (1, dims[i + 1]), jnp.float32, minval=-bound, maxval=bound
        )
        params.extend([w, b])
    return n_hl, tuple(params)


def _reference_forward(x, params, n_hl):
    """Plain-JAX reference matching the torch forward semantics (unfused)."""
    x = x.astype(jnp.float32)
    ws = params[0::2]
    bs = params[1::2]
    out = x @ ws[0] + bs[0]
    if n_hl == 1:
        out = out @ ws[1] + bs[1]
    elif n_hl == 2:
        out = out @ ws[1] + bs[1]
        out = jnp.maximum(out, 0.0)
        out = out @ ws[2] + bs[2]
    return out


# ------------------------------- main -------------------------------------- #

if __name__ == "__main__":
    key = jax.random.PRNGKey(0)

    input_size = 4
    action_size = 4

    all_ok = True
    for hidden_size in [(), (32,), (32, 32)]:
        key, kx, kp = jax.random.split(key, 3)

        n_hl, raw_params = init_net_params(kp, input_size, hidden_size, action_size)
        prepped, num_layers, act = prepare_params(raw_params, n_hl)

        # Small batch: force the Pallas path so the kernel itself is exercised.
        x_small = jax.random.normal(kx, (8, input_size), jnp.float32)
        out_small = jax.block_until_ready(
            net_forward(x_small, prepped, num_layers=num_layers, use_pallas=True)
        )
        ref_small = _reference_forward(x_small, raw_params, n_hl)
        assert out_small.shape == (8, action_size)
        all_ok &= bool(jnp.allclose(out_small, ref_small, atol=1e-4, rtol=1e-4))

        # Large batch: exercises the auto-guarded path with a 2-step parallel grid.
        key, kxl = jax.random.split(key)
        x_large = jax.random.normal(kxl, (1024, input_size), jnp.float32)
        out_large = jax.block_until_ready(
            net_forward(x_large, prepped, num_layers=num_layers)
        )
        ref_large = _reference_forward(x_large, raw_params, n_hl)
        assert out_large.shape == (1024, action_size)
        all_ok &= bool(jnp.allclose(out_large, ref_large, atol=1e-4, rtol=1e-4))

    assert all_ok, "mismatch vs pure-JAX reference"
    print("KERNEL_OK")
</pallas_src>

<mosaic_0001>
module attributes {stable_mosaic.version = 11 : i64} {
  func.func @_linear1_kernel(%arg0: i32, %arg1: memref<8x4xf32, #tpu.memory_space<vmem>>, %arg2: memref<4x4xf32, #tpu.memory_space<vmem>>, %arg3: memref<1x4xf32, #tpu.memory_space<vmem>>, %arg4: memref<8x4xf32, #tpu.memory_space<vmem>>) attributes {dimension_semantics = [#tpu.dimension_semantics<parallel>], iteration_bounds = array<i64: 1>, scalar_prefetch = 0 : i64, scratch_operands = 0 : i64, tpu.core_type = #tpu.core_type<tc>, window_params = [{transform_indices = @transform_0, window_bounds = array<i64: 8, 4>}, {pipeline_mode = #tpu.pipeline_mode<synchronous>, transform_indices = @transform_1, window_bounds = array<i64: 4, 4>}, {pipeline_mode = #tpu.pipeline_mode<synchronous>, transform_indices = @transform_2, window_bounds = array<i64: 1, 4>}, {transform_indices = @transform_3, window_bounds = array<i64: 8, 4>}]} {
    %c0 = arith.constant 0 : index
    %c0_0 = arith.constant 0 : index
    %0 = vector.load %arg1[%c0, %c0_0] : memref<8x4xf32, #tpu.memory_space<vmem>>, vector<8x4xf32>
    %c0_1 = arith.constant 0 : index
    %c0_2 = arith.constant 0 : index
    %1 = vector.load %arg2[%c0_1, %c0_2] : memref<4x4xf32, #tpu.memory_space<vmem>>, vector<4x4xf32>
    %cst = arith.constant dense<0.000000e+00> : vector<8x4xf32>
    %2 = tpu.matmul %0, %1, %cst {dimension_numbers = #tpu.dot_dimension_numbers<[1], [0], [0], [1], [0, 0, 1, 1], [], []>} : vector<8x4xf32>, vector<4x4xf32>, vector<8x4xf32> -> vector<8x4xf32>
    %c0_3 = arith.constant 0 : index
    %c0_4 = arith.constant 0 : index
    %3 = vector.load %arg3[%c0_3, %c0_4] : memref<1x4xf32, #tpu.memory_space<vmem>>, vector<1x4xf32>
    %4 = vector.broadcast %3 : vector<1x4xf32> to vector<8x4xf32>
    %5 = arith.addf %2, %4 : vector<8x4xf32>
    %c0_5 = arith.constant 0 : index
    %c0_6 = arith.constant 0 : index
    %6 = vector.load %arg4[%c0_5, %c0_6] : memref<8x4xf32, #tpu.memory_space<vmem>>, vector<8x4xf32>
    tpu.vector_store %arg4[%c0_5, %c0_6], %5 {strides = array<i32>} : memref<8x4xf32, #tpu.memory_space<vmem>>, vector<8x4xf32>,
    return
  }
  func.func @transform_0(%arg0: i32) -> (i32, i32) {
    %c0_i32 = arith.constant 0 : i32
    %c0_i32_0 = arith.constant 0 : i32
    return %arg0, %c0_i32 : i32, i32
  }
  func.func @transform_1(%arg0: i32) -> (i32, i32) {
    %c0_i32 = arith.constant 0 : i32
    %c0_i32_0 = arith.constant 0 : i32
    %c0_i32_1 = arith.constant 0 : i32
    return %c0_i32, %c0_i32_0 : i32, i32
  }
  func.func @transform_2(%arg0: i32) -> (i32, i32) {
    %c0_i32 = arith.constant 0 : i32
    %c0_i32_0 = arith.constant 0 : i32
    %c0_i32_1 = arith.constant 0 : i32
    return %c0_i32, %c0_i32_0 : i32, i32
  }
  func.func @transform_3(%arg0: i32) -> (i32, i32) {
    %c0_i32 = arith.constant 0 : i32
    %c0_i32_0 = arith.constant 0 : i32
    return %arg0, %c0_i32 : i32, i32
  }
}

</mosaic_0001>

<bundles_post_ra>
// kernel: net_forward.1
= control target key start
LH: loop header
LB: loop body
LE: loop exit
PB: predicated region body
PF: predicated region fallthrough
CT: control target
= control target key end

     0   :  { %vm27_vm0 = vcmask 1043456   ;;  %vm23_vm1 = vcmask 31744   ;;  %v118_v0 = vmov 0.0   ;;  %vm119_vm2 = vmmov 0   ;;  %s152_s1 = inlined_call_operand.vmem [shape: f32[4,4], index: 1, kind: input, shape index: {}]   ;;  %s153_s0 = inlined_call_operand.vmem [shape: f32[8,4], index: 0, kind: input, shape index: {}]   ;;  %s154_s2 = inlined_call_operand.vmem [shape: f32[1,4], index: 2, kind: input, shape index: {}]   ;;  %s155_s3 = inlined_call_operand.vmem [shape: f32[8,4], index: 3, kind: output, shape index: {}]  }
   0x1   :  { %111 = vmatprep.subr.mxu0 %v118_v0  ;;  %v15_v1 = vld [vmem:[%s152_s1] sm:$0xf]  ;;  %113 = vmatprep.mubr.msk.f32.mxu0 %vm119_vm2, %v118_v0 }
   0x2   :  { %v14_v2 = vld [vmem:[%s153_s0] sm:$0xff]  ;;  %112 = vmatpush3.msk.msra.mxu0 %vm27_vm0, %v15_v1 }
   0x3   :  { %114 = vmatmul.mubr.msk.f32.vlgmr.msra.gmra.mrb[0].mxu0 %vm23_vm1, %v14_v2  ;;  %v106_v3 = vld [vmem:[%s154_s2] ss:$0 sm:$0xff] }
  0xd6   :  { %v97_v4 = vpop.f32.mrb[0].mxu0 }
  0xd7   :  { %v98_v5 = vadd.f32 %v106_v3, %v97_v4  ;;  %v115_v6 = vpop.f32.mrb[1].mxu0 }
  0xd9   :  { %101 = vst.msk [vmem:[%s155_s3] sm:$0xff] %vm23_vm1, %v98_v5 }

</bundles_post_ra>
